<compile_context>
chip_gen: v5e
topology: v5e:2x2
jax: 0.10.0
libtpu: 0.0.40
codegen_flags: <defaults>
</compile_context>

<pallas_src>
import functools

import jax
import jax.numpy as jnp
import numpy as np
from jax import lax
from jax.experimental import pallas as pl
from jax.experimental.pallas import tpu as pltpu

BN_EPS = 1e-5


def _round_up(x, m):
    return ((x + m - 1) // m) * m


def _vmem_limit_bytes(est_bytes):
    """Generation-aware scoped-VMEM limit (<= 3/4 of physical capacity)."""
    try:
        cap = int(pltpu.get_tpu_info().vmem_capacity_bytes)
    except Exception:  # older jax / attribute mismatch: conservative default
        cap = 64 << 20
    return int(min(max(est_bytes, 32 << 20), (cap * 3) // 4))


def _pick_row_block(nrows, ohw, target_bytes=4 << 20):
    """Pass-2 row block: big lane-dense blocks, >= 2 grid steps when possible."""
    if nrows <= 8:
        return nrows
    row_bytes = 6 * ohw                      # bf16 read + f32 write per element
    r = max(8, min(nrows, target_bytes // max(row_bytes, 1)))
    if r >= nrows:
        r = max(8, nrows // 2)               # keep >= 2 parallel steps (megacore / 2-TC v7x)
    r = (r // 8) * 8                         # sublane-aligned block rows
    while r >= 8 and nrows % r:
        r -= 8
    return r if r >= 8 and nrows % r == 0 else nrows


def _conv_stats_kernel(x_ref, w_ref, y_ref, stats_ref, *, oh, ow, cin, cout):
    """Stride-2 3x3 conv as 9 tap matmuls on phase-split input + BN stats.

    x_ref     : (4*(OH+1), OW+1, Cin) bf16  -- 4 stride-2 phases of the padded
                input, stacked along the leading axis (phase-major).
    w_ref     : (9, Cout, Cin)        bf16  -- per-tap weights (tap = ih*3+iw).
    y_ref     : (Cout, OH*OW)         bf16  -- conv output, channel-major.
    stats_ref : (Cout, 2)             f32   -- per-channel [sum, sum-of-squares].
    """
    xv = x_ref[...]
    wv = w_ref[...]
    acc = jnp.zeros((cout, oh * ow), jnp.float32)
    for ih in range(3):
        for iw in range(3):
            p = (ih % 2) * 2 + (iw % 2)          # which stride-2 phase
            r0, c0 = ih // 2, iw // 2            # window offset inside the phase
            base = p * (oh + 1) + r0
            slab = xv[base:base + oh, c0:c0 + ow, :].reshape(oh * ow, cin)
            acc = acc + lax.dot_general(
                wv[ih * 3 + iw], slab,
                dimension_numbers=(((1,), (1,)), ((), ())),
                preferred_element_type=jnp.float32)        # MXU, f32 accumulation
    y_ref[...] = acc.astype(y_ref.dtype)                   # bf16 intermediate store
    stats_ref[...] = jnp.concatenate(                      # single fused (Cout, 2) store
        [jnp.sum(acc, axis=1, keepdims=True),
         jnp.sum(acc * acc, axis=1, keepdims=True)], axis=1)


def _bn_relu_kernel(y_ref, scale_ref, shift_ref, o_ref):
    # y_ref: (R, OHW) bf16 ; scale/shift: (R, 1) f32 ; o_ref: (R, OHW) f32
    y = y_ref[...].astype(jnp.float32)
    o_ref[...] = jnp.maximum(y * scale_ref[...] + shift_ref[...], 0.0)


@functools.partial(jax.jit, static_argnames=("kernel_size", "stride", "padding"))
def conv_bn_relu(x_nchw, conv_w, conv_b, gamma, beta,
                 kernel_size=3, stride=2, padding=1):
    """Forward pass of ConvBNRelu.

    x_nchw : (N, Cin, H, W) f32; conv_w : (Cout, Cin, 3, 3)
    conv_b, gamma, beta : (Cout,);   returns (N, Cout, OH, OW) f32.

    Notes: conv_b is accepted for API parity but unused -- a per-channel bias
    before training-mode BatchNorm is exactly cancelled by the mean
    subtraction.  Conv operands and the conv-output intermediate are bf16
    (f32 accumulation and f32 BN statistics); the final output is f32.
    """
    del conv_b
    if (kernel_size, stride, padding) != (3, 2, 1):
        raise NotImplementedError("kernel is specialised to k=3, stride=2, pad=1")
    n, cin, h, w = x_nchw.shape
    cout = conv_w.shape[0]
    oh = (h + 2 * padding - kernel_size) // stride + 1
    ow = (w + 2 * padding - kernel_size) // stride + 1
    ohw = oh * ow

    # Cheap XLA prep (no im2col inflation): NHWC, zero-pad to 2*(OH+1) x 2*(OW+1),
    # bf16-cast, and split into the 4 stride-2 phases so every conv tap becomes a
    # contiguous (OH, OW) window inside the kernel.
    x_nhwc = jnp.transpose(x_nchw, (0, 2, 3, 1)).astype(jnp.bfloat16)
    hp, wp = 2 * (oh + 1), 2 * (ow + 1)
    xp = jnp.pad(x_nhwc, ((0, 0),
                          (padding, hp - h - padding),
                          (padding, wp - w - padding),
                          (0, 0)))
    xs = xp.reshape(n, oh + 1, 2, ow + 1, 2, cin)
    xs = jnp.transpose(xs, (0, 2, 4, 1, 3, 5))          # (N, 2, 2, OH+1, OW+1, Cin)
    xs = xs.reshape(n, 4 * (oh + 1), ow + 1, cin)       # phase-major row axis

    # Per-tap weights (9, Cout, Cin), bf16 MXU operand.
    w9 = jnp.transpose(conv_w, (2, 3, 0, 1)).reshape(9, cout, cin).astype(jnp.bfloat16)

    # Rough double-buffered pass-1 VMEM footprint (with (sublane, lane) padding).
    x_blk = 4 * (oh + 1) * _round_up(ow + 1, 16) * _round_up(cin, 128) * 2
    y_blk = _round_up(cout, 16) * _round_up(ohw, 128) * 2
    w_blk = 9 * _round_up(cout, 16) * _round_up(cin, 128) * 2
    est1 = 2 * (x_blk + y_blk + _round_up(cout, 8) * 128 * 4) + w_blk + (2 << 20)
    vmem_limit = _vmem_limit_bytes(est1)
    cparams = pltpu.CompilerParams(
        dimension_semantics=("parallel",),
        vmem_limit_bytes=vmem_limit)

    # Pass 1: fused in-kernel im2col conv (9 MXU tap matmuls, f32 acc) + BN stats.
    # TODO(synk): for large images / channel counts, add an output-row tile axis
    # (halo DMA) plus Cout/K blocking; one sample per grid step suffices here.
    kern = functools.partial(_conv_stats_kernel, oh=oh, ow=ow, cin=cin, cout=cout)
    y, stats = pl.pallas_call(
        kern,
        grid=(n,),
        in_specs=[
            pl.BlockSpec((None, 4 * (oh + 1), ow + 1, cin), lambda i: (i, 0, 0, 0)),
            pl.BlockSpec((9, cout, cin), lambda i: (0, 0, 0)),
        ],
        out_specs=(
            pl.BlockSpec((None, cout, ohw), lambda i: (i, 0, 0)),
            pl.BlockSpec((None, cout, 2), lambda i: (i, 0, 0)),
        ),
        out_shape=(
            jax.ShapeDtypeStruct((n, cout, ohw), jnp.bfloat16),
            jax.ShapeDtypeStruct((n, cout, 2), jnp.float32),
        ),
        compiler_params=cparams,
    )(xs, w9)

    # Tiny JAX glue: finalize batch statistics, fold gamma/rsqrt into scale/shift.
    # TODO(synk): E[y^2]-E[y]^2 in f32 can cancel when |mean| >> std; switch to
    # per-sample mean-centered partials if that regime matters.
    m_total = jnp.float32(n * ohw)
    s = jnp.sum(stats, axis=0)                                # (Cout, 2)
    mean = s[:, 0] / m_total
    var = jnp.maximum(s[:, 1] / m_total - mean * mean, 0.0)    # biased batch var
    inv_std = lax.rsqrt(var + BN_EPS)
    g32 = gamma.astype(jnp.float32)
    scale_c = g32 * inv_std                                    # (Cout,)
    shift_c = beta.astype(jnp.float32) - mean * scale_c

    # Pass 2: streaming per-channel affine + ReLU over big lane-dense row blocks
    # of the flattened (N*Cout, OH*OW) intermediate.
    nrows = n * cout
    y2 = y.reshape(nrows, ohw)                                 # free reshape (contiguous)
    scale_rows = jnp.tile(scale_c[None, :], (n, 1)).reshape(nrows, 1)
    shift_rows = jnp.tile(shift_c[None, :], (n, 1)).reshape(nrows, 1)
    r_blk = _pick_row_block(nrows, ohw)
    # TODO(synk): alias y -> out (input_output_aliases) if a bf16 module output is acceptable.
    out = pl.pallas_call(
        _bn_relu_kernel,
        grid=(nrows // r_blk,),
        in_specs=[
            pl.BlockSpec((r_blk, ohw), lambda i: (i, 0)),
            pl.BlockSpec((r_blk, 1), lambda i: (i, 0)),
            pl.BlockSpec((r_blk, 1), lambda i: (i, 0)),
        ],
        out_specs=pl.BlockSpec((r_blk, ohw), lambda i: (i, 0)),
        out_shape=jax.ShapeDtypeStruct((nrows, ohw), jnp.float32),
        compiler_params=pltpu.CompilerParams(
            dimension_semantics=("parallel",),
            vmem_limit_bytes=vmem_limit),
    )(y2, scale_rows, shift_rows)

    # (N*Cout, OH*OW) is already NCHW order -> pure reshape, no transpose.
    return out.reshape(n, cout, oh, ow)


def _reference(x_nchw, conv_w, conv_b, gamma, beta, stride=2, padding=1):
    """Pure-JAX reference (conv + training-mode BN + ReLU).

    The conv output is rounded through bf16 before the affine (BN statistics
    stay f32) to mirror the kernel's bf16 intermediate precision.
    """
    y = lax.conv_general_dilated(
        x_nchw, conv_w, window_strides=(stride, stride),
        padding=((padding, padding), (padding, padding)),
        dimension_numbers=("NCHW", "OIHW", "NCHW"))
    y = y + conv_b.reshape(1, -1, 1, 1)
    mean = jnp.mean(y, axis=(0, 2, 3), keepdims=True)
    var = jnp.mean((y - mean) ** 2, axis=(0, 2, 3), keepdims=True)
    yq = y.astype(jnp.bfloat16).astype(jnp.float32)
    out = (yq - mean) * lax.rsqrt(var + BN_EPS)
    out = out * gamma.reshape(1, -1, 1, 1) + beta.reshape(1, -1, 1, 1)
    return jnp.maximum(out, 0.0)


if __name__ == "__main__":
    # Small shapes consistent with ConvBNRelu(in_channels=4, out_channels=8)
    N, CIN, H, W = 2, 4, 16, 16
    COUT, KH, KW = 8, 3, 3

    key = jax.random.PRNGKey(0)
    kx, kw_, kb, kg, kbt = jax.random.split(key, 5)

    x = jax.random.normal(kx, (N, CIN, H, W), dtype=jnp.float32)
    fan_in = CIN * KH * KW
    bound = 1.0 / np.sqrt(fan_in)
    conv_w = jax.random.uniform(kw_, (COUT, CIN, KH, KW),
                                minval=-bound, maxval=bound, dtype=jnp.float32)
    conv_b = jax.random.uniform(kb, (COUT,), minval=-bound, maxval=bound,
                                dtype=jnp.float32)
    gamma = 1.0 + 0.1 * jax.random.normal(kg, (COUT,), dtype=jnp.float32)
    beta = 0.1 * jax.random.normal(kbt, (COUT,), dtype=jnp.float32)

    out = jax.block_until_ready(conv_bn_relu(x, conv_w, conv_b, gamma, beta))
    assert out.shape == (N, COUT, H // 2, W // 2), out.shape

    # Reference with conv inputs quantized to bf16 (the kernel's MXU operand
    # precision) and the conv output rounded through bf16 (the kernel's
    # intermediate precision), so the check isolates kernel numerics.
    x_q = x.astype(jnp.bfloat16).astype(jnp.float32)
    w_q = conv_w.astype(jnp.bfloat16).astype(jnp.float32)
    ref = jax.block_until_ready(_reference(x_q, w_q, conv_b, gamma, beta))
    np.testing.assert_allclose(np.asarray(out), np.asarray(ref),
                               rtol=2e-2, atol=2e-2)
    print("KERNEL_OK")
</pallas_src>

<mosaic_0001>
module attributes {stable_mosaic.version = 11 : i64} {
  func.func @_conv_stats_kernel(%arg0: i32, %arg1: memref<1x36x9x4xbf16, #tpu.memory_space<vmem>>, %arg2: memref<9x8x4xbf16, #tpu.memory_space<vmem>>, %arg3: memref<1x8x64xbf16, #tpu.memory_space<vmem>>, %arg4: memref<1x8x2xf32, #tpu.memory_space<vmem>>) attributes {dimension_semantics = [#tpu.dimension_semantics<parallel>], iteration_bounds = array<i64: 2>, scalar_prefetch = 0 : i64, scratch_operands = 0 : i64, tpu.core_type = #tpu.core_type<tc>, window_params = [{transform_indices = @transform_0, window_bounds = array<i64: 1, 36, 9, 4>}, {pipeline_mode = #tpu.pipeline_mode<synchronous>, transform_indices = @transform_1, window_bounds = array<i64: 9, 8, 4>}, {transform_indices = @transform_2, window_bounds = array<i64: 1, 8, 64>}, {transform_indices = @transform_3, window_bounds = array<i64: 1, 8, 2>}]} {
    %c0 = arith.constant 0 : index
    %c0_0 = arith.constant 0 : index
    %c0_1 = arith.constant 0 : index
    %c0_2 = arith.constant 0 : index
    %0 = vector.load %arg1[%c0, %c0_0, %c0_1, %c0_2] : memref<1x36x9x4xbf16, #tpu.memory_space<vmem>>, vector<1x36x9x4xbf16>
    %1 = vector.shape_cast %0 : vector<1x36x9x4xbf16> to vector<36x9x4xbf16>
    %c0_3 = arith.constant 0 : index
    %c0_4 = arith.constant 0 : index
    %c0_5 = arith.constant 0 : index
    %2 = vector.load %arg2[%c0_3, %c0_4, %c0_5] : memref<9x8x4xbf16, #tpu.memory_space<vmem>>, vector<9x8x4xbf16>
    %cst = arith.constant 0.000000e+00 : f32
    %3 = vector.broadcast %cst : f32 to vector<8x64xf32>
    %4 = vector.extract_strided_slice %1 {offsets = [0, 0, 0], sizes = [8, 8, 4], strides = [1, 1, 1]} : vector<36x9x4xbf16> to vector<8x8x4xbf16>
    %5 = vector.shape_cast %4 : vector<8x8x4xbf16> to vector<64x4xbf16>
    %6 = vector.extract_strided_slice %2 {offsets = [0, 0, 0], sizes = [1, 8, 4], strides = [1, 1, 1]} : vector<9x8x4xbf16> to vector<1x8x4xbf16>
    %7 = vector.shape_cast %6 : vector<1x8x4xbf16> to vector<8x4xbf16>
    %cst_6 = arith.constant dense<0.000000e+00> : vector<8x64xf32>
    %8 = tpu.matmul %7, %5, %cst_6 {dimension_numbers = #tpu.dot_dimension_numbers<[1], [1], [0], [0], [0, 0, 1, 0], [], []>} : vector<8x4xbf16>, vector<64x4xbf16>, vector<8x64xf32> -> vector<8x64xf32>
    %9 = arith.addf %3, %8 : vector<8x64xf32>
    %10 = vector.extract_strided_slice %1 {offsets = [9, 0, 0], sizes = [8, 8, 4], strides = [1, 1, 1]} : vector<36x9x4xbf16> to vector<8x8x4xbf16>
    %11 = vector.shape_cast %10 : vector<8x8x4xbf16> to vector<64x4xbf16>
    %12 = vector.extract_strided_slice %2 {offsets = [1, 0, 0], sizes = [1, 8, 4], strides = [1, 1, 1]} : vector<9x8x4xbf16> to vector<1x8x4xbf16>
    %13 = vector.shape_cast %12 : vector<1x8x4xbf16> to vector<8x4xbf16>
    %cst_7 = arith.constant dense<0.000000e+00> : vector<8x64xf32>
    %14 = tpu.matmul %13, %11, %cst_7 {dimension_numbers = #tpu.dot_dimension_numbers<[1], [1], [0], [0], [0, 0, 1, 0], [], []>} : vector<8x4xbf16>, vector<64x4xbf16>, vector<8x64xf32> -> vector<8x64xf32>
    %15 = arith.addf %9, %14 : vector<8x64xf32>
    %16 = vector.extract_strided_slice %1 {offsets = [0, 1, 0], sizes = [8, 8, 4], strides = [1, 1, 1]} : vector<36x9x4xbf16> to vector<8x8x4xbf16>
    %17 = vector.shape_cast %16 : vector<8x8x4xbf16> to vector<64x4xbf16>
    %18 = vector.extract_strided_slice %2 {offsets = [2, 0, 0], sizes = [1, 8, 4], strides = [1, 1, 1]} : vector<9x8x4xbf16> to vector<1x8x4xbf16>
    %19 = vector.shape_cast %18 : vector<1x8x4xbf16> to vector<8x4xbf16>
    %cst_8 = arith.constant dense<0.000000e+00> : vector<8x64xf32>
    %20 = tpu.matmul %19, %17, %cst_8 {dimension_numbers = #tpu.dot_dimension_numbers<[1], [1], [0], [0], [0, 0, 1, 0], [], []>} : vector<8x4xbf16>, vector<64x4xbf16>, vector<8x64xf32> -> vector<8x64xf32>
    %21 = arith.addf %15, %20 : vector<8x64xf32>
    %22 = vector.extract_strided_slice %1 {offsets = [18, 0, 0], sizes = [8, 8, 4], strides = [1, 1, 1]} : vector<36x9x4xbf16> to vector<8x8x4xbf16>
    %23 = vector.shape_cast %22 : vector<8x8x4xbf16> to vector<64x4xbf16>
    %24 = vector.extract_strided_slice %2 {offsets = [3, 0, 0], sizes = [1, 8, 4], strides = [1, 1, 1]} : vector<9x8x4xbf16> to vector<1x8x4xbf16>
    %25 = vector.shape_cast %24 : vector<1x8x4xbf16> to vector<8x4xbf16>
    %cst_9 = arith.constant dense<0.000000e+00> : vector<8x64xf32>
    %26 = tpu.matmul %25, %23, %cst_9 {dimension_numbers = #tpu.dot_dimension_numbers<[1], [1], [0], [0], [0, 0, 1, 0], [], []>} : vector<8x4xbf16>, vector<64x4xbf16>, vector<8x64xf32> -> vector<8x64xf32>
    %27 = arith.addf %21, %26 : vector<8x64xf32>
    %28 = vector.extract_strided_slice %1 {offsets = [27, 0, 0], sizes = [8, 8, 4], strides = [1, 1, 1]} : vector<36x9x4xbf16> to vector<8x8x4xbf16>
    %29 = vector.shape_cast %28 : vector<8x8x4xbf16> to vector<64x4xbf16>
    %30 = vector.extract_strided_slice %2 {offsets = [4, 0, 0], sizes = [1, 8, 4], strides = [1, 1, 1]} : vector<9x8x4xbf16> to vector<1x8x4xbf16>
    %31 = vector.shape_cast %30 : vector<1x8x4xbf16> to vector<8x4xbf16>
    %cst_10 = arith.constant dense<0.000000e+00> : vector<8x64xf32>
    %32 = tpu.matmul %31, %29, %cst_10 {dimension_numbers = #tpu.dot_dimension_numbers<[1], [1], [0], [0], [0, 0, 1, 0], [], []>} : vector<8x4xbf16>, vector<64x4xbf16>, vector<8x64xf32> -> vector<8x64xf32>
    %33 = arith.addf %27, %32 : vector<8x64xf32>
    %34 = vector.extract_strided_slice %1 {offsets = [18, 1, 0], sizes = [8, 8, 4], strides = [1, 1, 1]} : vector<36x9x4xbf16> to vector<8x8x4xbf16>
    %35 = vector.shape_cast %34 : vector<8x8x4xbf16> to vector<64x4xbf16>
    %36 = vector.extract_strided_slice %2 {offsets = [5, 0, 0], sizes = [1, 8, 4], strides = [1, 1, 1]} : vector<9x8x4xbf16> to vector<1x8x4xbf16>
    %37 = vector.shape_cast %36 : vector<1x8x4xbf16> to vector<8x4xbf16>
    %cst_11 = arith.constant dense<0.000000e+00> : vector<8x64xf32>
    %38 = tpu.matmul %37, %35, %cst_11 {dimension_numbers = #tpu.dot_dimension_numbers<[1], [1], [0], [0], [0, 0, 1, 0], [], []>} : vector<8x4xbf16>, vector<64x4xbf16>, vector<8x64xf32> -> vector<8x64xf32>
    %39 = arith.addf %33, %38 : vector<8x64xf32>
    %40 = vector.extract_strided_slice %1 {offsets = [1, 0, 0], sizes = [8, 8, 4], strides = [1, 1, 1]} : vector<36x9x4xbf16> to vector<8x8x4xbf16>
    %41 = vector.shape_cast %40 : vector<8x8x4xbf16> to vector<64x4xbf16>
    %42 = vector.extract_strided_slice %2 {offsets = [6, 0, 0], sizes = [1, 8, 4], strides = [1, 1, 1]} : vector<9x8x4xbf16> to vector<1x8x4xbf16>
    %43 = vector.shape_cast %42 : vector<1x8x4xbf16> to vector<8x4xbf16>
    %cst_12 = arith.constant dense<0.000000e+00> : vector<8x64xf32>
    %44 = tpu.matmul %43, %41, %cst_12 {dimension_numbers = #tpu.dot_dimension_numbers<[1], [1], [0], [0], [0, 0, 1, 0], [], []>} : vector<8x4xbf16>, vector<64x4xbf16>, vector<8x64xf32> -> vector<8x64xf32>
    %45 = arith.addf %39, %44 : vector<8x64xf32>
    %46 = vector.extract_strided_slice %1 {offsets = [10, 0, 0], sizes = [8, 8, 4], strides = [1, 1, 1]} : vector<36x9x4xbf16> to vector<8x8x4xbf16>
    %47 = vector.shape_cast %46 : vector<8x8x4xbf16> to vector<64x4xbf16>
    %48 = vector.extract_strided_slice %2 {offsets = [7, 0, 0], sizes = [1, 8, 4], strides = [1, 1, 1]} : vector<9x8x4xbf16> to vector<1x8x4xbf16>
    %49 = vector.shape_cast %48 : vector<1x8x4xbf16> to vector<8x4xbf16>
    %cst_13 = arith.constant dense<0.000000e+00> : vector<8x64xf32>
    %50 = tpu.matmul %49, %47, %cst_13 {dimension_numbers = #tpu.dot_dimension_numbers<[1], [1], [0], [0], [0, 0, 1, 0], [], []>} : vector<8x4xbf16>, vector<64x4xbf16>, vector<8x64xf32> -> vector<8x64xf32>
    %51 = arith.addf %45, %50 : vector<8x64xf32>
    %52 = vector.extract_strided_slice %1 {offsets = [1, 1, 0], sizes = [8, 8, 4], strides = [1, 1, 1]} : vector<36x9x4xbf16> to vector<8x8x4xbf16>
    %53 = vector.shape_cast %52 : vector<8x8x4xbf16> to vector<64x4xbf16>
    %54 = vector.extract_strided_slice %2 {offsets = [8, 0, 0], sizes = [1, 8, 4], strides = [1, 1, 1]} : vector<9x8x4xbf16> to vector<1x8x4xbf16>
    %55 = vector.shape_cast %54 : vector<1x8x4xbf16> to vector<8x4xbf16>
    %cst_14 = arith.constant dense<0.000000e+00> : vector<8x64xf32>
    %56 = tpu.matmul %55, %53, %cst_14 {dimension_numbers = #tpu.dot_dimension_numbers<[1], [1], [0], [0], [0, 0, 1, 0], [], []>} : vector<8x4xbf16>, vector<64x4xbf16>, vector<8x64xf32> -> vector<8x64xf32>
    %57 = arith.addf %51, %56 : vector<8x64xf32>
    %58 = arith.truncf %57 : vector<8x64xf32> to vector<8x64xbf16>
    %c0_15 = arith.constant 0 : index
    %c0_16 = arith.constant 0 : index
    %c0_17 = arith.constant 0 : index
    %59 = vector.load %arg3[%c0_15, %c0_16, %c0_17] : memref<1x8x64xbf16, #tpu.memory_space<vmem>>, vector<1x8x64xbf16>
    %60 = vector.shape_cast %59 : vector<1x8x64xbf16> to vector<8x64xbf16>
    %61 = vector.shape_cast %58 : vector<8x64xbf16> to vector<1x8x64xbf16>
    tpu.vector_store %arg3[%c0_15, %c0_16, %c0_17], %61 {strides = array<i32>} : memref<1x8x64xbf16, #tpu.memory_space<vmem>>, vector<1x8x64xbf16>,
    %cst_18 = arith.constant dense<0.000000e+00> : vector<8xf32>
    %62 = vector.multi_reduction <add>, %57, %cst_18 [1] : vector<8x64xf32> to vector<8xf32>
    %63 = vector.shape_cast %62 : vector<8xf32> to vector<8x1xf32>
    %64 = arith.mulf %57, %57 : vector<8x64xf32>
    %cst_19 = arith.constant dense<0.000000e+00> : vector<8xf32>
    %65 = vector.multi_reduction <add>, %64, %cst_19 [1] : vector<8x64xf32> to vector<8xf32>
    %66 = vector.shape_cast %65 : vector<8xf32> to vector<8x1xf32>
    %67 = tpu.concatenate %63, %66 in 1 : vector<8x1xf32>, vector<8x1xf32> -> vector<8x2xf32>
    %c0_20 = arith.constant 0 : index
    %c0_21 = arith.constant 0 : index
    %c0_22 = arith.constant 0 : index
    %68 = vector.load %arg4[%c0_20, %c0_21, %c0_22] : memref<1x8x2xf32, #tpu.memory_space<vmem>>, vector<1x8x2xf32>
    %69 = vector.shape_cast %68 : vector<1x8x2xf32> to vector<8x2xf32>
    %70 = vector.shape_cast %67 : vector<8x2xf32> to vector<1x8x2xf32>
    tpu.vector_store %arg4[%c0_20, %c0_21, %c0_22], %70 {strides = array<i32>} : memref<1x8x2xf32, #tpu.memory_space<vmem>>, vector<1x8x2xf32>,
    return
  }
  func.func @transform_0(%arg0: i32) -> (i32, i32, i32, i32) {
    %c0_i32 = arith.constant 0 : i32
    %c0_i32_0 = arith.constant 0 : i32
    %c0_i32_1 = arith.constant 0 : i32
    %c0_i32_2 = arith.constant 0 : i32
    return %arg0, %c0_i32, %c0_i32_0, %c0_i32_1 : i32, i32, i32, i32
  }
  func.func @transform_1(%arg0: i32) -> (i32, i32, i32) {
    %c0_i32 = arith.constant 0 : i32
    %c0_i32_0 = arith.constant 0 : i32
    %c0_i32_1 = arith.constant 0 : i32
    %c0_i32_2 = arith.constant 0 : i32
    return %c0_i32, %c0_i32_0, %c0_i32_1 : i32, i32, i32
  }
  func.func @transform_2(%arg0: i32) -> (i32, i32, i32) {
    %c0_i32 = arith.constant 0 : i32
    %c0_i32_0 = arith.constant 0 : i32
    %c0_i32_1 = arith.constant 0 : i32
    return %arg0, %c0_i32, %c0_i32_0 : i32, i32, i32
  }
  func.func @transform_3(%arg0: i32) -> (i32, i32, i32) {
    %c0_i32 = arith.constant 0 : i32
    %c0_i32_0 = arith.constant 0 : i32
    %c0_i32_1 = arith.constant 0 : i32
    return %arg0, %c0_i32, %c0_i32_0 : i32, i32, i32
  }
}

module attributes {stable_mosaic.version = 11 : i64} {
  func.func @_bn_relu_kernel(%arg0: i32, %arg1: memref<8x64xbf16, #tpu.memory_space<vmem>>, %arg2: memref<8x1xf32, #tpu.memory_space<vmem>>, %arg3: memref<8x1xf32, #tpu.memory_space<vmem>>, %arg4: memref<8x64xf32, #tpu.memory_space<vmem>>) attributes {dimension_semantics = [#tpu.dimension_semantics<parallel>], iteration_bounds = array<i64: 2>, scalar_prefetch = 0 : i64, scratch_operands = 0 : i64, tpu.core_type = #tpu.core_type<tc>, window_params = [{transform_indices = @transform_0, window_bounds = array<i64: 8, 64>}, {transform_indices = @transform_1, window_bounds = array<i64: 8, 1>}, {transform_indices = @transform_2, window_bounds = array<i64: 8, 1>}, {transform_indices = @transform_3, window_bounds = array<i64: 8, 64>}]} {
    %c0 = arith.constant 0 : index
    %c0_0 = arith.constant 0 : index
    %0 = vector.load %arg1[%c0, %c0_0] : memref<8x64xbf16, #tpu.memory_space<vmem>>, vector<8x64xbf16>
    %1 = arith.extf %0 : vector<8x64xbf16> to vector<8x64xf32>
    %c0_1 = arith.constant 0 : index
    %c0_2 = arith.constant 0 : index
    %2 = vector.load %arg2[%c0_1, %c0_2] : memref<8x1xf32, #tpu.memory_space<vmem>>, vector<8x1xf32>
    %3 = vector.broadcast %2 : vector<8x1xf32> to vector<8x64xf32>
    %4 = arith.mulf %1, %3 : vector<8x64xf32>
    %c0_3 = arith.constant 0 : index
    %c0_4 = arith.constant 0 : index
    %5 = vector.load %arg3[%c0_3, %c0_4] : memref<8x1xf32, #tpu.memory_space<vmem>>, vector<8x1xf32>
    %6 = vector.broadcast %5 : vector<8x1xf32> to vector<8x64xf32>
    %7 = arith.addf %4, %6 : vector<8x64xf32>
    %cst = arith.constant 0.000000e+00 : f32
    %8 = vector.broadcast %cst : f32 to vector<8x64xf32>
    %9 = arith.maximumf %7, %8 : vector<8x64xf32>
    %c0_5 = arith.constant 0 : index
    %c0_6 = arith.constant 0 : index
    %10 = vector.load %arg4[%c0_5, %c0_6] : memref<8x64xf32, #tpu.memory_space<vmem>>, vector<8x64xf32>
    tpu.vector_store %arg4[%c0_5, %c0_6], %9 {strides = array<i32>} : memref<8x64xf32, #tpu.memory_space<vmem>>, vector<8x64xf32>,
    return
  }
  func.func @transform_0(%arg0: i32) -> (i32, i32) {
    %c0_i32 = arith.constant 0 : i32
    %c0_i32_0 = arith.constant 0 : i32
    return %arg0, %c0_i32 : i32, i32
  }
  func.func @transform_1(%arg0: i32) -> (i32, i32) {
    %c0_i32 = arith.constant 0 : i32
    %c0_i32_0 = arith.constant 0 : i32
    return %arg0, %c0_i32 : i32, i32
  }
  func.func @transform_2(%arg0: i32) -> (i32, i32) {
    %c0_i32 = arith.constant 0 : i32
    %c0_i32_0 = arith.constant 0 : i32
    return %arg0, %c0_i32 : i32, i32
  }
  func.func @transform_3(%arg0: i32) -> (i32, i32) {
    %c0_i32 = arith.constant 0 : i32
    %c0_i32_0 = arith.constant 0 : i32
    return %arg0, %c0_i32 : i32, i32
  }
}

</mosaic_0001>

<bundles_post_ra>
// kernel: tile.10
= control target key start
LH: loop header
LB: loop body
LE: loop exit
PB: predicated region body
PF: predicated region fallthrough
CT: control target
= control target key end

     0   :  { %s22_s0 = inlined_call_operand.vmem [shape: f32[8], index: 0, kind: input, shape index: {}]   ;;  %s23_s1 = inlined_call_operand.vmem [shape: f32[2,1,1,8], index: 1, kind: output, shape index: {}]  }
   0x1   :  { %v4_v0 = vld [vmem:[%s22_s0] ss:$0 sm:$0xff] }
   0x2   :  { %5 = vst [vmem:[%s23_s1] sm:$0x3] %v4_v0 }

// kernel: tile.0
= control target key start
LH: loop header
LB: loop body
LE: loop exit
PB: predicated region body
PF: predicated region fallthrough
CT: control target
= control target key end

     0   :  { %s66_s8 = smov 125   ;;  %s67_s9 = smov 123   ;;  %vm7_vm0 = vcmask 7168   ;;  %s117_s0 = inlined_call_operand.vmem [shape: f32[2,1,1,8], index: 0, kind: input, shape index: {}]   ;;  %s118_s1 = inlined_call_operand.vmem [shape: f32[16,1], index: 1, kind: output, shape index: {}]  }
   0x1   :  { %v4_v0 = vld [vmem:[%s117_s0] sm:$0x3]  ;;  %s65_s0 = smov 127   ;;  %s68_s10 = smov 126  }
   0x2   :  { %5 = vst [vmem:[#allocation0] sm:$0x3] %v4_v0  ;;  %s69_s11 = smov 124   ;;  %s70_s12 = smov 122  }
   0x3   :  { %s71_s13 = smov 121  }
   0x9   :  { %v9_v1 = vld [vmem:[#allocation0] sm:$0x3]  }
   0xa   :  { %v21_v2 = vld [vmem:[#allocation0] sm:$0x3]   ;;  %10 = vrot.lane.b32.xlu0 %v9_v1, %s65_s0 }
   0xb   :  { %22 = vrot.lane.b32.xlu1 %v21_v2, %s66_s8  ;;  %v33_v3 = vld [vmem:[#allocation0] sm:$0x3]  }
   0xc   :  { %34 = vrot.lane.b32.xlu2 %v33_v3, %s67_s9  ;;  %v15_v4 = vld [vmem:[#allocation0] sm:$0x3]  }
   0xd   :  { %v27_v5 = vld [vmem:[#allocation0] sm:$0x3]  }
   0xe   :  { %v39_v6 = vld [vmem:[#allocation0] sm:$0x3]  }
   0xf   :  { %v45_v7 = vld [vmem:[#allocation0] sm:$0x3]  }
  0x10   :  { %v6_v8 = vld [vmem:[#allocation0] sm:$0x3]  }
  0x11   :  { %8 = vst.msk [vmem:[%s118_s1] ss:$8 sm:$0x3] %vm7_vm0, %v6_v8  }
  0x12   :  { %16 = vrot.lane.b32.xlu0 %v15_v4, %s68_s10 }
  0x13   :  { %28 = vrot.lane.b32.xlu1 %v27_v5, %s69_s11 }
  0x14   :  { %40 = vrot.lane.b32.xlu2 %v39_v6, %s70_s12 }
  0x1a   :  { %46 = vrot.lane.b32.xlu0 %v45_v7, %s71_s13 }
  0x66   :  { %v35_v9 = vpop.permute.xlu2 %34  }
  0x67   :  { %55 = vst.msk [vmem:[%s118_s1 + $0x5] ss:$8 sm:$0x3] %vm7_vm0, %v35_v9  }
  0x6e   :  { %v41_v10 = vpop.permute.xlu2 %40  }
  0x6f   :  { %56 = vst.msk [vmem:[%s118_s1 + $0x6] ss:$8 sm:$0x3] %vm7_vm0, %v41_v10  }
  0x7c   :  { %v11_v11 = vpop.permute.xlu0 %10  }
  0x7d   :  { %v23_v12 = vpop.permute.xlu1 %22   ;;  %51 = vst.msk [vmem:[%s118_s1 + $0x1] ss:$8 sm:$0x3] %vm7_vm0, %v11_v11  }
  0x7e   :  { %53 = vst.msk [vmem:[%s118_s1 + $0x3] ss:$8 sm:$0x3] %vm7_vm0, %v23_v12  }
  0x84   :  { %v17_v13 = vpop.permute.xlu0 %16  }
  0x85   :  { %v29_v14 = vpop.permute.xlu1 %28   ;;  %52 = vst.msk [vmem:[%s118_s1 + $0x2] ss:$8 sm:$0x3] %vm7_vm0, %v17_v13  }
  0x86   :  { %54 = vst.msk [vmem:[%s118_s1 + $0x4] ss:$8 sm:$0x3] %vm7_vm0, %v29_v14  }
  0x8c   :  { %v47_v15 = vpop.permute.xlu0 %46  }
  0x8d   :  { %57 = vst.msk [vmem:[%s118_s1 + $0x7] ss:$8 sm:$0x3] %vm7_vm0, %v47_v15  }

// kernel: conv_bn_relu.3
= control target key start
LH: loop header
LB: loop body
LE: loop exit
PB: predicated region body
PF: predicated region fallthrough
CT: control target
= control target key end

     0   :  { %s346_s12 = smov 0   ;;  %s369_s0 = inlined_call_operand.vmem [shape: bf16[16,64], index: 0, kind: input, shape index: {}]   ;;  %s370_s1 = inlined_call_operand.vmem [shape: f32[16,1], index: 1, kind: input, shape index: {}]   ;;  %s371_s2 = inlined_call_operand.vmem [shape: f32[16,1], index: 2, kind: input, shape index: {}]   ;;  %s372_s3 = inlined_call_operand.vmem [shape: f32[16,64], index: 3, kind: output, shape index: {}]  }
   0x1 LB: > { %s296_s13 = sadd.s32 4294967295, %s323_s12   ;;  %p300_p0 = scmp.ge.s32.totalorder %s323_s12, 1  ;;  %s323_s12 = sphi %s346_s12, %s13_s12  }
   0x2   : > { %p154_p1 = scmp.lt.s32.totalorder %s323_s12, 3 }
   0x4   : > { %p155_p2 = pnand %p300_p0, %p154_p1 }
   0x5   : > { %p184_p3 = scmp.lt.s32.totalorder (!%p155_p2), %s296_s13, 1 }
   0x6   : > { %158 = sbr.rel (%p155_p2) target bundleno = 143 (0x8f), region = 32 }
   0xb   : > { %v325_v0 = vmov 0   ;;  %s374_s13 = smov (!%p184_p3, %s296_s13), 1  ;;  %vm217_vm0 = vcmask 523264  }
   0xc   : > { %316 = vset.pattern.permute.xlu0 %v325_v0  ;;  %s302_s14 = sshll.u32 %s374_s13, 3  ;;  %s301_s21 = sshll.u32 %s374_s13, 2 }
   0xd   : > { %s191_s17 = scalar_lea.vmem %s370_s1, %s302_s14  ;;  %s195_s20 = scalar_lea.vmem %s371_s2, %s302_s14 }
   0xe   : > { %v202_v1 = vld [vmem:[%s191_s17] sm:$0xff]  ;;  %s187_s24 = scalar_lea.vmem %s369_s0, %s301_s21  ;;  %s199_s27 = scalar_lea.vmem %s372_s3, %s302_s14 }
   0xf   : > { %205 = vperm.xlu0 %316, %v202_v1   ;;  %v209_v2 = vld [vmem:[%s195_s20] sm:$0xff] }
  0x10   : > { %v200_v4 = vld [vmem:[%s187_s24] sm:$0xf] }
  0x11   : > { %v201_v5 = vunpack.c.l.bf16 %v200_v4 }
  0x17   : > { %212 = vperm.xlu0 %316, %v209_v2  }
  0x81   : > { %v206_v3 = vpop.permute.xlu0 %205 }
  0x82   : > { %v208_v6 = vmul.f32 %v206_v3, %v201_v5 }
  0x89   : > { %v213_v7 = vpop.permute.xlu0 %212 }
  0x8a   : > { %v215_v8 = vadd.f32 %v213_v7, %v208_v6 }
  0x8c   : > { %v216_v9 = vmax.f32 %v215_v8, 0.0 }
  0x8e   : > { %218 = vst.msk [vmem:[%s199_s27] sm:$0xff] %vm217_vm0, %v216_v9 }
  0x8f PF: > { %s13_s12 = sadd.s32 1, %s323_s12  }
  0x90   : > { %p10_p4 = scmp.ge.s32.totalorder %s13_s12, 4  }
  0x92   :  { %12 = sbr.rel (!%p10_p4) target bundleno = 1 (0x1), region = 68 }

// kernel: conv_bn_relu.2
= control target key start
LH: loop header
LB: loop body
LE: loop exit
PB: predicated region body
PF: predicated region fallthrough
CT: control target
= control target key end

     0   :  { %s1058_s12 = smov 0   ;;  %s1399_s0 = inlined_call_operand.vmem [shape: bf16[2,36,9,4], index: 0, kind: input, shape index: {}]   ;;  %s1400_s1 = inlined_call_operand.vmem [shape: bf16[9,8,4], index: 1, kind: input, shape index: {}]   ;;  %s1401_s2 = inlined_call_operand.vmem [shape: bf16[2,8,64], index: 2, kind: output, shape index: {0}]   ;;  %s1402_s3 = inlined_call_operand.vmem [shape: f32[2,8,2], index: 3, kind: output, shape index: {1}]  }
   0x1 LB: > { %s962_s13 = sadd.s32 4294967295, %s1036_s12   ;;  %p966_p0 = scmp.ge.s32.totalorder %s1036_s12, 1  ;;  %s1036_s12 = sphi %s1058_s12, %s14_s12  }
   0x2   : > { %p140_p1 = scmp.lt.s32.totalorder %s1036_s12, 3 }
   0x4   : > { %p141_p2 = pnand %p966_p0, %p140_p1 }
   0x5   : > { %p167_p3 = scmp.lt.s32.totalorder (!%p141_p2), %s962_s13, 1 }
   0x6   : > { %144 = sbr.rel (%p141_p2) target bundleno = 371 (0x173), region = 28 }
   0xb   : > { %s1414_s13 = smov (!%p167_p3, %s962_s13), 1  ;;  %vm261_vm0 = vcmask 31744   ;;  %vm338_vm1 = vsmask.f32 3328  ;;  %vm339_vm2 = vsmask.f32 7440 }
   0xc   : > { %s1021_s14 = smul.u32 288, %s1414_s13  ;;  %vm1129_vm3 = vmor %vm338_vm1, %vm339_vm2  ;;  %v239_v37 = vld [vmem:[%s1400_s1 + $0x1c] sm:$0xf]  ;;  %s968_s9 = sshll.u32 %s1414_s13, 2  ;;  %vm866_vm4 = vcmask 523264   ;;  %vm864_vm5 = vcmask 519168  }
   0xd   : > { %s969_s15 = sshll.u32 %s1414_s13, 3  ;;  %vm874_vm6 = vcmask 7168   ;;  %vm876_vm7 = vcmask 15360  }
   0xe   : > { %s1072_s17 = scalar_lea.vmem %s1399_s0, %s1021_s14  ;;  %s175_s14 = scalar_lea.vmem %s1401_s2, %s968_s9 }
   0xf   : > { %v1075_v0 = vld [vmem:[%s1072_s17 + $0x78] sm:$0xf]  ;;  %v1078_v1 = vld [vmem:[%s1072_s17 + $0x80] sm:$0xf]  ;;  %v1081_v2 = vld [vmem:[%s1072_s17 + $0x30] sm:$0xf]  ;;  %s179_s18 = scalar_lea.vmem %s1402_s3, %s969_s15 }
  0x10   : > { %v255_v3 = vunpack.c.l.b16 %v1075_v0  ;;  %v256_v4 = vunpack.c.l.b16 %v1078_v1  ;;  %v1086_v5 = vld [vmem:[%s1072_s17 + $0x38] sm:$0xf]  ;;  %v304_v6 = vunpack.c.l.b16 %v1081_v2  ;;  %v426_v7 = vshrl.u32 %v1081_v2, 16  ;;  %v1091_v8 = vld [vmem:[%s1072_s17 + $0x68] sm:$0xf] }
  0x11   : > { %v305_v9 = vunpack.c.l.b16 %v1086_v5  ;;  %v429_v10 = vshll.u32 %v1081_v2, 16  ;;  %v440_v11 = vshrl.u32 %v1086_v5, 16  ;;  %v443_v12 = vshll.u32 %v1086_v5, 16  ;;  %v1098_v13 = vld [vmem:[%s1072_s17 + $0x70] sm:$0xf] }
  0x12   : > { %v260_v14 = vpack.c.b16 %v256_v4, %v255_v3  ;;  %v428_v15 = vrot.slane %v426_v7, 4  ;;  %v253_v16 = vunpack.c.l.b16 %v1091_v8  ;;  %v254_v17 = vunpack.c.l.b16 %v1098_v13  ;;  %v194_v18 = vld [vmem:[%s1072_s17 + $0x34] sm:$0x1]  ;;  %v196_v19 = vld [vmem:[%s1072_s17 + $0x3c] sm:$0x1] }
  0x13   : > { %v309_v20 = vpack.c.b16 %v305_v9, %v304_v6  ;;  %v431_v21 = vrot.slane %v429_v10, 5  ;;  %v442_v22 = vrot.slane %v440_v11, 4  ;;  %v445_v23 = vrot.slane %v443_v12, 5  ;;  %v987_v24 = vld [vmem:[%s1072_s17 + $0xc0] sm:$0xf] }
  0x14   : > { %v275_v25 = vsel %vm261_vm0, %v260_v14, 0  ;;  %v259_v26 = vpack.c.b16 %v254_v17, %v253_v16  ;;  %v435_v27 = vshll.u32 %v194_v18, 16  ;;  %v449_v28 = vshll.u32 %v196_v19, 16  ;;  %v1016_v29 = vld [vmem:[%s1072_s17 + $0xc4] sm:$0xf0] }
  0x15   : > { %281 = vmatpush.bf16.xpose.msra.mxu0 %v275_v25  ;;  %v323_v30 = vsel %vm261_vm0, %v309_v20, 0  ;;  %v432_v31 = vor.u32 %v431_v21, %v428_v15  ;;  %v446_v32 = vor.u32 %v445_v23, %v442_v22  ;;  %v988_v33 = vor.u32 %v1016_v29, %v987_v24  ;;  %v1121_v34 = vld [vmem:[%s1072_s17 + $0x20] sm:$0xf]  ;;  %v1124_v35 = vld [vmem:[%s1072_s17 + $0x28] sm:$0xf] }
  0x16   : > { %329 = vmatpush.bf16.xpose.msra.mxu1 %v323_v30  ;;  %v272_v36 = vsel %vm261_vm0, %v259_v26, 0  ;;  %v437_v38 = vrot.slane %v435_v27, 5  ;;  %v451_v39 = vrot.slane %v449_v28, 5  ;;  %v302_v40 = vunpack.c.l.b16 %v1121_v34  ;;  %v1135_v41 = vld [vmem:[%s1072_s17 + $0x58] sm:$0xf] }
  0x17   : > { %v433_v42 = vrot.slane %v432_v31, 4  ;;  %v447_v43 = vrot.slane %v446_v32, 4  ;;  %v527_v44 = vsel %vm261_vm0, %v988_v33, 0  ;;  %v303_v45 = vunpack.c.l.b16 %v1124_v35  ;;  %v1144_v50 = vld [vmem:[%s1072_s17 + $0x60] sm:$0xf] }
  0x18   : > { %533 = vmatpush.bf16.xpose.msra.mxu3 %v527_v44  ;;  %v398_v46 = vshrl.u32 %v1121_v34, 16  ;;  %v401_v47 = vshll.u32 %v1121_v34, 16  ;;  %v412_v48 = vshrl.u32 %v1124_v35, 16  ;;  %v415_v49 = vshll.u32 %v1124_v35, 16  ;;  %v190_v55 = vld [vmem:[%s1072_s17 + $0x24] sm:$0x1] }
  0x19   : > { %v438_v51 = vsel %vm1129_vm3, %v433_v42, %v437_v38  ;;  %v452_v52 = vsel %vm1129_vm3, %v447_v43, %v451_v39  ;;  %v308_v53 = vpack.c.b16 %v303_v45, %v302_v40  ;;  %v1403_v54 = vunpack.c.l.b16 %v1135_v41  ;;  %v192_v56 = vld [vmem:[%s1072_s17 + $0x2c] sm:$0x1]  ;;  %v983_v61 = vld [vmem:[%s1072_s17 + $0xb0] sm:$0xf]  ;;  %v1015_v62 = vld [vmem:[%s1072_s17 + $0xb4] sm:$0xf0] }
  0x1a   : > { %v1157_v57 = vunpack.c.l.b16 %v438_v51  ;;  %v1159_v58 = vunpack.c.l.b16 %v452_v52  ;;  %v400_v59 = vrot.slane %v398_v46, 4  ;;  %v403_v60 = vrot.slane %v401_v47, 5  ;;  %v1168_v19 = vld [vmem:[%s1072_s17 + $0x10] sm:$0xf]  ;;  %v1175_v23 = vld [vmem:[%s1072_s17 + $0x18] sm:$0xf] }
  0x1b   : > { %v320_v63 = vsel %vm261_vm0, %v308_v53, 0  ;;  %v414_v7 = vrot.slane %v412_v48, 4  ;;  %v417_v10 = vrot.slane %v415_v49, 5  ;;  %v252_v11 = vunpack.c.l.b16 %v1144_v50  ;;  %v199_v29 = vld [vmem:[%s1072_s17 + $0x48] sm:$0xf] }
  0x1c   : > { %v464_v12 = vpack.c.b16 %v1159_v58, %v1157_v57  ;;  %v404_v14 = vor.u32 %v403_v60, %v400_v59  ;;  %v407_v15 = vshll.u32 %v190_v55, 16  ;;  %v421_v18 = vshll.u32 %v192_v56, 16  ;;  %v1181_v30 = vld [vmem:[%s1072_s17 + $0x50] sm:$0xf]  ;;  %v186_v38 = vld [vmem:[%s1072_s17 + $0x14] sm:$0x1] }
  0x1d   : > { %282 = vmatpush.bf16.xpose.msra.mxu0 %v272_v36  ;;  %v258_v20 = vpack.c.b16 %v252_v11, %v1403_v54  ;;  %v418_v21 = vor.u32 %v417_v10, %v414_v7  ;;  %v984_v22 = vor.u32 %v1015_v62, %v983_v61  ;;  %v1405_v24 = vunpack.c.l.b16 %v1168_v19  ;;  %v188_v39 = vld [vmem:[%s1072_s17 + $0x1c] sm:$0x1]  ;;  %v979_v47 = vld [vmem:[%s1072_s17 + $0xa0] sm:$0xf]  ;;  %v1014_v53 = vld [vmem:[%s1072_s17 + $0xa4] sm:$0xf0] }
  0x1e   : > { %v478_v25 = vsel %vm261_vm0, %v464_v12, 0  ;;  %330 = vmatpush.bf16.xpose.msra.mxu1 %v320_v63  ;;  %v405_v26 = vrot.slane %v404_v14, 4  ;;  %v409_v27 = vrot.slane %v407_v15, 5  ;;  %v423_v28 = vrot.slane %v421_v18, 5  ;;  %v1004_v55 = vld [vmem:[%s1072_s17 + $0x108] sm:$0xf] }
  0x1f   : > { %484 = vmatpush.bf16.xpose.msra.mxu2 %v478_v25  ;;  %v269_v31 = vsel %vm261_vm0, %v258_v20, 0  ;;  %v419_v32 = vrot.slane %v418_v21, 4  ;;  %v524_v33 = vsel %vm261_vm0, %v984_v22, 0  ;;  %v301_v36 = vunpack.c.l.b16 %v1175_v23  ;;  %v1020_v62 = vld [vmem:[%s1072_s17 + $0x10c] sm:$0xf0] }
  0x20   : > { %v410_v42 = vsel %vm1129_vm3, %v405_v26, %v409_v27  ;;  %534 = vmatpush.bf16.xpose.msra.mxu3 %v524_v33  ;;  %v370_v43 = vshrl.u32 %v1168_v19, 16  ;;  %v373_v44 = vshll.u32 %v1168_v19, 16  ;;  %v384_v46 = vshrl.u32 %v1175_v23, 16  ;;  %v181_v27 = vld [vmem:[%s1072_s17] sm:$0xf] }
  0x21   : > { %v424_v48 = vsel %vm1129_vm3, %v419_v32, %v423_v28  ;;  %v1196_v49 = vunpack.c.l.b16 %v410_v42  ;;  %v307_v51 = vpack.c.b16 %v301_v36, %v1405_v24  ;;  %v387_v52 = vshll.u32 %v1175_v23, 16  ;;  %v1217_v42 = vld [vmem:[%s1072_s17 + $0x8] sm:$0xf]  ;;  %v219_v5 = vld [vmem:[%s1072_s17 + $0xbc] sm:$0x1] }
  0x22   : > { %v1205_v56 = vunpack.c.l.b16 %v424_v48  ;;  %v372_v59 = vrot.slane %v370_v43, 4  ;;  %v375_v60 = vrot.slane %v373_v44, 5  ;;  %v386_v61 = vrot.slane %v384_v46, 4  ;;  %v235_v1 = vld [vmem:[%s1400_s1 + $0xc] sm:$0xf] }
  0x23   : > { %v317_v63 = vsel %vm261_vm0, %v307_v51, 0  ;;  %v389_v7 = vrot.slane %v387_v52, 5  ;;  %v249_v10 = vunpack.c.l.b16 %v199_v29  ;;  %v1404_v12 = vunpack.c.l.b16 %v1181_v30  ;;  %v220_v51 = vld [vmem:[%s1072_s17 + $0xc0] sm:$0xf] }
  0x24   : > { %v463_v14 = vpack.c.b16 %v1205_v56, %v1196_v49  ;;  %v376_v15 = vor.u32 %v375_v60, %v372_v59  ;;  %v379_v18 = vshll.u32 %v186_v38, 16  ;;  %v393_v20 = vshll.u32 %v188_v39, 16  ;;  %v221_v60 = vld [vmem:[%s1072_s17 + $0xc4] sm:$0x1] }
  0x25   : > { %283 = vmatpush.bf16.xpose.msra.mxu0 %v269_v31  ;;  %v257_v21 = vpack.c.b16 %v1404_v12, %v249_v10  ;;  %v390_v22 = vor.u32 %v389_v7, %v386_v61  ;;  %v980_v25 = vor.u32 %v1014_v53, %v979_v47  ;;  %v1005_v26 = vor.u32 %v1020_v62, %v1004_v55  ;;  %v222_v61 = vld [vmem:[%s1072_s17 + $0xc8] sm:$0xf] }
  0x26   : > { %v475_v28 = vsel %vm261_vm0, %v463_v14, 0  ;;  %331 = vmatpush.bf16.xpose.msra.mxu1 %v317_v63  ;;  %v377_v29 = vrot.slane %v376_v15, 4  ;;  %v381_v32 = vrot.slane %v379_v18, 5  ;;  %v395_v33 = vrot.slane %v393_v20, 5  ;;  %v223_v14 = vld [vmem:[%s1072_s17 + $0xcc] sm:$0x1] }
  0x27   : > { %485 = vmatpush.bf16.xpose.msra.mxu2 %v475_v28  ;;  %v266_v31 = vsel %vm261_vm0, %v257_v21, 0  ;;  %v391_v38 = vrot.slane %v390_v22, 4  ;;  %v521_v39 = vsel %vm261_vm0, %v980_v25, 0  ;;  %v576_v43 = vsel %vm261_vm0, %v1005_v26, 0  ;;  %v182_v15 = vld [vmem:[%s1072_s17 + $0x4] sm:$0x1] }
  0x28   : > { %v382_v44 = vsel %vm1129_vm3, %v377_v29, %v381_v32  ;;  %535 = vmatpush.bf16.xpose.msra.mxu3 %v521_v39  ;;  %v298_v46 = vunpack.c.l.b16 %v181_v27  ;;  %v1406_v47 = vunpack.c.l.b16 %v1217_v42  ;;  %v342_v48 = vshrl.u32 %v181_v27, 16  ;;  %v184_v25 = vld [vmem:[%s1072_s17 + $0xc] sm:$0x1]  ;;  %v975_v32 = vld [vmem:[%s1072_s17 + $0x90] sm:$0xf] }
  0x29   : > { %v396_v52 = vsel %vm1129_vm3, %v391_v38, %v395_v33  ;;  %v1228_v53 = vunpack.c.l.b16 %v382_v44  ;;  %v345_v55 = vshll.u32 %v181_v27, 16  ;;  %v356_v59 = vshrl.u32 %v1217_v42, 16  ;;  %v1013_v33 = vld [vmem:[%s1072_s17 + $0x94] sm:$0xf0] }
  0x2a   : > { %v1233_v62 = vunpack.c.l.b16 %v396_v52  ;;  %v306_v63 = vpack.c.b16 %v1406_v47, %v298_v46  ;;  %v344_v7 = vrot.slane %v342_v48, 4  ;;  %v359_v10 = vshll.u32 %v1217_v42, 16  ;;  %v1000_v48 = vld [vmem:[%s1072_s17 + $0xf8] sm:$0xf] }
  0x2b   : > { %v347_v18 = vrot.slane %v345_v55, 5  ;;  %v358_v20 = vrot.slane %v356_v59, 4  ;;  %v677_v21 = vshrl.u32 %v220_v51, 16  ;;  %v680_v22 = vshll.u32 %v220_v51, 16 }
  0x2c   : > { %v462_v26 = vpack.c.b16 %v1233_v62, %v1228_v53  ;;  %v314_v27 = vsel %vm261_vm0, %v306_v63, 0  ;;  %v361_v28 = vrot.slane %v359_v10, 5  ;;  %v686_v29 = vshll.u32 %v221_v60, 16  ;;  %v1019_v63 = vld [vmem:[%s1072_s17 + $0xfc] sm:$0xf0] }
  0x2d   : > { %284 = vmatpush.bf16.xpose.msra.mxu0 %v266_v31  ;;  %v679_v38 = vrot.slane %v677_v21, 4  ;;  %v682_v39 = vrot.slane %v680_v22, 5  ;;  %v691_v44 = vshrl.u32 %v222_v61, 16  ;;  %v694_v46 = vshll.u32 %v222_v61, 16  ;;  %v197_v31 = vld [vmem:[%s1072_s17 + $0x40] sm:$0xf] }
  0x2e   : > { %v472_v51 = vsel %vm261_vm0, %v462_v26, 0  ;;  %332 = vmatpush.bf16.xpose.msra.mxu1 %v314_v27  ;;  %v688_v52 = vrot.slane %v686_v29, 5  ;;  %v700_v55 = vshll.u32 %v223_v14, 16  ;;  %v348_v59 = vor.u32 %v347_v18, %v344_v7  ;;  %v233_v7 = vld [vmem:[%s1400_s1 + $0x4] sm:$0xf] }
  0x2f   : > { %486 = vmatpush.bf16.xpose.msra.mxu2 %v472_v51  ;;  %v683_v10 = vor.u32 %v682_v39, %v679_v38  ;;  %v693_v60 = vrot.slane %v691_v44, 4  ;;  %v696_v54 = vrot.slane %v694_v46, 5  ;;  %v351_v12 = vshll.u32 %v182_v15, 16  ;;  %v232_v15 = vld [vmem:[%s1400_s1] sm:$0xf] }
  0x30   : > { %v702_v21 = vrot.slane %v700_v55, 5  ;;  %v349_v22 = vrot.slane %v348_v59, 4  ;;  %v362_v24 = vor.u32 %v361_v28, %v358_v20  ;;  %v365_v61 = vshll.u32 %v184_v25, 16  ;;  %v207_v28 = vld [vmem:[%s1072_s17 + $0x88] sm:$0xf] }
  0x31   : > { %v684_v47 = vrot.slane %v683_v10, 4  ;;  %v697_v26 = vor.u32 %v696_v54, %v693_v60  ;;  %v976_v27 = vor.u32 %v1013_v33, %v975_v32  ;;  %v1001_v29 = vor.u32 %v1019_v63, %v1000_v48  ;;  %v216_v32 = vld [vmem:[%s1072_s17 + $0xb0] sm:$0xf]  ;;  %v217_v63 = vld [vmem:[%s1072_s17 + $0xb4] sm:$0x1] }
  0x32   : > { %v363_v14 = vrot.slane %v362_v24, 4  ;;  %v367_v18 = vrot.slane %v365_v61, 5  ;;  %v746_v38 = vunpack.c.l.b16 %v197_v31  ;;  %v816_v51 = vshrl.u32 %v197_v31, 16  ;;  %v218_v10 = vld [vmem:[%s1072_s17 + $0xb8] sm:$0xf] }
  0x33   : > { %v689_v20 = vsel %vm1129_vm3, %v684_v47, %v688_v52  ;;  %v698_v25 = vrot.slane %v697_v26, 4  ;;  %v573_v44 = vsel %vm261_vm0, %v1001_v29, 0  ;;  %v819_v55 = vshll.u32 %v197_v31, 16 }
  0x34   : > { %v710_v24 = vunpack.c.l.b16 %v689_v20  ;;  %v368_v33 = vsel %vm1129_vm3, %v363_v14, %v367_v18  ;;  %970 = vmatmul.msk.bf16.vlgmr.msra.gmra.mxu0 %vm261_vm0, %v233_v7  ;;  %v750_v48 = vpack.c.b16 %v746_v38, %v305_v9  ;;  %v781_v59 = vunpack.c.l.b16 %v207_v28  ;;  %v996_v7 = vld [vmem:[%s1072_s17 + $0xe8] sm:$0xf]  ;;  %v1018_v14 = vld [vmem:[%s1072_s17 + $0xec] sm:$0xf0]  ;;  %v212_v20 = vld [vmem:[%s1072_s17 + $0xa0] sm:$0xf] }
  0x35   : > { %582 = vmatpush.bf16.xpose.msrb.mxu0 %v576_v43  ;;  %v353_v43 = vrot.slane %v351_v12, 5  ;;  %v518_v12 = vsel %vm261_vm0, %v976_v27, 0  ;;  %v703_v47 = vsel %vm1129_vm3, %v698_v25, %v702_v21  ;;  %v1269_v46 = vunpack.c.l.b16 %v368_v33  ;;  %971 = vmatmul.msk.bf16.vlgmr.msra.gmra.mxu1 %vm261_vm0, %v232_v15  ;;  %v213_v28 = vld [vmem:[%s1072_s17 + $0xa4] sm:$0x1] }
  0x36   : > { %536 = vmatpush.bf16.xpose.msra.mxu3 %v518_v12  ;;  %v711_v52 = vunpack.c.l.b16 %v703_v47  ;;  %v649_v60 = vshrl.u32 %v216_v32, 16  ;;  %v1278_v61 = vrot.slane %v816_v51, 4  ;;  %v652_v9 = vshll.u32 %v216_v32, 16 }
  0x37   : > { %v354_v54 = vsel %vm1129_vm3, %v349_v22, %v353_v43  ;;  %v764_v22 = vsel %vm261_vm0, %v750_v48, 0  ;;  %v821_v43 = vrot.slane %v819_v55, 5  ;;  %v785_v27 = vpack.c.b16 %v781_v59, %v256_v4  ;;  %v234_v55 = vld [vmem:[%s1400_s1 + $0x8] sm:$0xf] }
  0x38   : > { %v453_v39 = vunpack.c.l.b16 %v354_v54  ;;  %v715_v26 = vpack.c.b16 %v711_v52, %v710_v24  ;;  %v651_v31 = vrot.slane %v649_v60, 4  ;;  %v654_v29 = vrot.slane %v652_v9, 5  ;;  %v215_v52 = vld [vmem:[%s1072_s17 + $0xac] sm:$0x1] }
  0x39   : > { %v658_v38 = vshll.u32 %v217_v63, 16  ;;  %v663_v15 = vshrl.u32 %v218_v10, 16  ;;  %v799_v54 = vsel %vm261_vm0, %v785_v27, 0  ;;  %v666_v12 = vshll.u32 %v218_v10, 16 }
  0x3a   : > { %v461_v21 = vpack.c.b16 %v1269_v46, %v453_v39  ;;  %v729_v25 = vsel %vm261_vm0, %v715_v26, 0  ;;  %v655_v4 = vor.u32 %v654_v29, %v651_v31  ;;  %v672_v33 = vshll.u32 %v219_v5, 16  ;;  %v214_v39 = vld [vmem:[%s1072_s17 + $0xa8] sm:$0xf] }
  0x3b   : > { %735 = vmatpush.bf16.xpose.msrb.mxu1 %v729_v25  ;;  %v660_v32 = vrot.slane %v658_v38, 5  ;;  %v665_v24 = vrot.slane %v663_v15, 4  ;;  %v668_v47 = vrot.slane %v666_v12, 5  ;;  %v997_v48 = vor.u32 %v1018_v14, %v996_v7  ;;  %v198_v14 = vld [vmem:[%s1072_s17 + $0x44] sm:$0x1] }
  0x3c   : > { %v469_v18 = vsel %vm261_vm0, %v461_v21, 0  ;;  %v749_v51 = vpack.c.b16 %v304_v6, %v303_v45  ;;  %v656_v59 = vrot.slane %v655_v4, 4  ;;  %v674_v63 = vrot.slane %v672_v33, 5  ;;  %v992_v21 = vld [vmem:[%s1072_s17 + $0xd8] sm:$0xf] }
  0x3d   : > { %583 = vmatpush.bf16.xpose.msrb.mxu0 %v573_v44  ;;  %487 = vmatpush.bf16.xpose.msra.mxu2 %v469_v18  ;;  %v822_v44 = vor.u32 %v821_v43, %v1278_v61  ;;  %v784_v10 = vpack.c.b16 %v255_v3, %v254_v17  ;;  %v621_v60 = vshrl.u32 %v212_v20, 16  ;;  %v669_v35 = vor.u32 %v668_v47, %v665_v24 }
  0x3e   : > { %805 = vmatpush.bf16.xpose.msrb.mxu3 %v799_v54  ;;  %v570_v2 = vsel %vm261_vm0, %v997_v48, 0  ;;  %v761_v6 = vsel %vm261_vm0, %v749_v51, 0  ;;  %v624_v45 = vshll.u32 %v212_v20, 16  ;;  %v661_v61 = vsel %vm1129_vm3, %v656_v59, %v660_v32  ;;  %v208_v20 = vld [vmem:[%s1072_s17 + $0x90] sm:$0xf] }
  0x3f   : > { %989 = vmatmul.msk.bf16.vlgmr.msra.gmra.mxu3 %vm261_vm0, %v235_v1  ;;  %v796_v13 = vsel %vm261_vm0, %v784_v10, 0  ;;  %v623_v0 = vrot.slane %v621_v60, 4  ;;  %v630_v3 = vshll.u32 %v213_v28, 16  ;;  %v670_v17 = vrot.slane %v669_v35, 4  ;;  %v209_v1 = vld [vmem:[%s1072_s17 + $0x94] sm:$0x1] }
  0x40   : > { %v708_v5 = vunpack.c.l.b16 %v661_v61  ;;  %v626_v9 = vrot.slane %v624_v45, 5  ;;  %v635_v26 = vshrl.u32 %v214_v39, 16  ;;  %v638_v27 = vshll.u32 %v214_v39, 16  ;;  %v211_v51 = vld [vmem:[%s1072_s17 + $0x9c] sm:$0x1] }
  0x41   : > { %v632_v43 = vrot.slane %v630_v3, 5  ;;  %v644_v31 = vshll.u32 %v215_v52, 16  ;;  %v675_v18 = vsel %vm1129_vm3, %v670_v17, %v674_v63  ;;  %v748_v15 = vpack.c.b16 %v302_v40, %v301_v36  ;;  %v210_v36 = vld [vmem:[%s1072_s17 + $0x98] sm:$0xf] }
  0x42   : > { %v627_v29 = vor.u32 %v626_v9, %v623_v0  ;;  %v637_v38 = vrot.slane %v635_v26, 4  ;;  %v823_v25 = vrot.slane %v822_v44, 4  ;;  %v709_v54 = vunpack.c.l.b16 %v675_v18 }
  0x43   : > { %v640_v12 = vrot.slane %v638_v27, 5  ;;  %v646_v28 = vrot.slane %v644_v31, 5  ;;  %v783_v23 = vpack.c.b16 %v253_v16, %v252_v11  ;;  %v825_v34 = vshll.u32 %v198_v14, 16 }
  0x44   : > { %972 = vmatmul.msk.bf16.vlgmr.msra.gmra.mxu2 %vm261_vm0, %v234_v55  ;;  %v628_v4 = vrot.slane %v627_v29, 4  ;;  %v714_v24 = vpack.c.b16 %v709_v54, %v708_v5  ;;  %v593_v33 = vshrl.u32 %v208_v20, 16  ;;  %v596_v39 = vshll.u32 %v208_v20, 16  ;;  %v236_v5 = vld [vmem:[%s1400_s1 + $0x10] sm:$0xf] }
  0x45   : > { %770 = vmatpush.bf16.xpose.msrb.mxu2 %v764_v22  ;;  %v1017_v22 = vld [vmem:[%s1072_s17 + $0xdc] sm:$0xf0]  ;;  %584 = vmatpush.bf16.xpose.msrb.mxu0 %v570_v2  ;;  %v641_v40 = vor.u32 %v640_v12, %v637_v38  ;;  %v758_v47 = vsel %vm261_vm0, %v748_v15, 0  ;;  %v827_v48 = vrot.slane %v825_v34, 5  ;;  %v602_v52 = vshll.u32 %v209_v1, 16 }
  0x46   : > { %v993_v7 = vor.u32 %v1017_v22, %v992_v21  ;;  %806 = vmatpush.bf16.xpose.msrb.mxu3 %v796_v13  ;;  %v633_v44 = vsel %vm1129_vm3, %v628_v4, %v632_v43  ;;  %v726_v55 = vsel %vm261_vm0, %v714_v24, 0  ;;  %v793_v8 = vsel %vm261_vm0, %v783_v23, 0  ;;  %v237_v4 = vld [vmem:[%s1400_s1 + $0x14] sm:$0xf] }
  0x47   : > { %v642_v50 = vrot.slane %v641_v40, 4  ;;  %v595_v16 = vrot.slane %v593_v33, 4  ;;  %736 = vmatpush.bf16.xpose.msrb.mxu1 %v726_v55  ;;  %v706_v11 = vunpack.c.l.b16 %v633_v44  ;;  %v828_v59 = vsel %vm1129_vm3, %v823_v25, %v827_v48 }
  0x48   : > { %v567_v32 = vsel %vm261_vm0, %v993_v7, 0  ;;  %v598_v63 = vrot.slane %v596_v39, 5  ;;  %v607_v10 = vshrl.u32 %v210_v36, 16  ;;  %v829_v21 = vunpack.c.l.b16 %v828_v59 }
  0x49   : > { %v647_v60 = vsel %vm1129_vm3, %v642_v50, %v646_v28  ;;  %v610_v35 = vshll.u32 %v210_v36, 16  ;;  %v616_v2 = vshll.u32 %v211_v51, 16  ;;  %v604_v22 = vrot.slane %v602_v52, 5 }
  0x4a   : > { %v599_v45 = vor.u32 %v598_v63, %v595_v16  ;;  %v609_v61 = vrot.slane %v607_v10, 4  ;;  %v833_v13 = vpack.c.b16 %v829_v21, %v1159_v58  ;;  %v1409_v9 = vunpack.c.l.b16 %v1217_v42 }
  0x4b   : > { %v612_v0 = vrot.slane %v610_v35, 5  ;;  %v1410_v26 = vunpack.c.l.b16 %v1168_v19  ;;  %v618_v7 = vrot.slane %v616_v2, 5  ;;  %v1411_v14 = vunpack.c.l.b16 %v1181_v30 }
  0x4c   : > { %v600_v17 = vrot.slane %v599_v45, 4  ;;  %v847_v27 = vsel %vm261_vm0, %v833_v13, 0  ;;  %v1412_v58 = vunpack.c.l.b16 %v1135_v41  ;;  %v832_v19 = vpack.c.b16 %v1157_v57, %v1205_v56  ;;  %v238_v57 = vld [vmem:[%s1400_s1 + $0x18] sm:$0xf] }
  0x4d   : > { %771 = vmatpush.bf16.xpose.msrb.mxu2 %v761_v6  ;;  %585 = vmatpush.bf16.xpose.msrb.mxu0 %v567_v32  ;;  %v707_v6 = vunpack.c.l.b16 %v647_v60  ;;  %v747_v43 = vpack.c.b16 %v1410_v26, %v1409_v9  ;;  %v613_v31 = vor.u32 %v612_v0, %v609_v61  ;;  %v831_v56 = vpack.c.b16 %v1196_v49, %v1233_v62  ;;  %v240_v32 = vld [vmem:[%s1400_s1 + $0x20] sm:$0xf] }
  0x4e   : > { %807 = vmatpush.bf16.xpose.msrb.mxu3 %v793_v8  ;;  %v782_v18 = vpack.c.b16 %v1412_v58, %v1411_v14  ;;  %v605_v38 = vsel %vm1129_vm3, %v600_v17, %v604_v22  ;;  %v844_v54 = vsel %vm261_vm0, %v832_v19, 0  ;;  %v830_v49 = vpack.c.b16 %v1228_v53, %v1269_v46 }
  0x4f   : > { %v713_v3 = vpack.c.b16 %v707_v6, %v706_v11  ;;  %v614_v15 = vrot.slane %v613_v31, 4  ;;  %v704_v42 = vunpack.c.l.b16 %v605_v38  ;;  %v755_v20 = vsel %vm261_vm0, %v747_v43, 0 }
  0x50   : > { %v790_v30 = vsel %vm261_vm0, %v782_v18, 0  ;;  %v841_v1 = vsel %vm261_vm0, %v831_v56, 0  ;;  %v838_v62 = vsel %vm261_vm0, %v830_v49, 0 }
  0x51   : > { %v723_v29 = vsel %vm261_vm0, %v713_v3, 0  ;;  %v619_v41 = vsel %vm1129_vm3, %v614_v15, %v618_v7 }
  0x52   : > { %737 = vmatpush.bf16.xpose.msrb.mxu1 %v723_v29  ;;  %v705_v25 = vunpack.c.l.b16 %v619_v41 }
  0x54   : > { %1006 = vmatmul.msk.bf16.vlgmr.msrb.gmra.mxu0 %vm261_vm0, %v236_v5  ;;  %v712_v12 = vpack.c.b16 %v705_v25, %v704_v42 }
  0x55   : > { %772 = vmatpush.bf16.xpose.msrb.mxu2 %v758_v47  ;;  %853 = vmatpush.bf16.xpose.msra.mxu0 %v847_v27 }
  0x56   : > { %808 = vmatpush.bf16.xpose.msrb.mxu3 %v790_v30  ;;  %v720_v28 = vsel %vm261_vm0, %v712_v12, 0 }
  0x5a   : > { %738 = vmatpush.bf16.xpose.msrb.mxu1 %v720_v28 }
  0x5d   : > { %773 = vmatpush.bf16.xpose.msrb.mxu2 %v755_v20  ;;  %854 = vmatpush.bf16.xpose.msra.mxu0 %v844_v54 }
  0x5e   : > { %1009 = vmatmul.msk.bf16.vlgmr.msrb.gmra.mxu3 %vm261_vm0, %v239_v37 }
  0x61   : > { %1007 = vmatmul.msk.bf16.vlgmr.msrb.gmra.mxu1 %vm261_vm0, %v237_v4 }
  0x64   : > { %1008 = vmatmul.msk.bf16.vlgmr.msrb.gmra.mxu2 %vm261_vm0, %v238_v57 }
  0x65   : > { %855 = vmatpush.bf16.xpose.msra.mxu0 %v841_v1 }
  0x6d   : > { %856 = vmatpush.bf16.xpose.msra.mxu0 %v838_v62 }
  0x74   : > { %1010 = vmatmul.msk.bf16.vlgmr.msra.gmra.mxu0 %vm261_vm0, %v240_v32 }
  0xb1   : > { %v286_v23 = vpop.f32.mrf.mxu0 }
  0xb2   : > { %v334_v34 = vpop.f32.mrf.mxu1 }
  0xb3   : > { %v335_v53 = vadd.f32 %v334_v34, %v286_v23 }
  0xb9   : > { %v288_v24 = vpop.f32.mrf.mxu0 }
  0xba   : > { %v336_v40 = vpop.f32.mrf.mxu1 }
  0xc2   : > { %v538_v36 = vpop.f32.mrf.mxu3 }
  0xc7   : > { %v489_v33 = vpop.f32.mrf.mxu2 }
  0xc8   : > { %v493_v48 = vadd.f32 %v489_v33, %v335_v53 }
  0xca   : > { %v540_v39 = vpop.f32.mrf.mxu3  ;;  %v542_v51 = vadd.f32 %v538_v36, %v493_v48 }
  0xcf   : > { %v491_v47 = vpop.f32.mrf.mxu2 }
  0xd1   : > { %v587_v44 = vpop.f32.mrf.mxu0 }
  0xd2   : > { %v591_v8 = vadd.f32 %v587_v44, %v542_v51 }
  0xd9   : > { %v589_v46 = vpop.f32.mrf.mxu0 }
  0xde   : > { %v740_v52 = vpop.f32.mrf.mxu1 }
  0xdf   : > { %v744_v16 = vadd.f32 %v740_v52, %v591_v8 }
  0xe1   : > { %v810_v50 = vpop.f32.mrf.mxu3 }
  0xe6   : > { %v742_v11 = vpop.f32.mrf.mxu1 }
  0xe7   : > { %v775_v55 = vpop.f32.mrf.mxu2 }
  0xe8   : > { %v779_v59 = vadd.f32 %v775_v55, %v744_v16 }
  0xe9   : > { %v812_v10 = vpop.f32.mrf.mxu3 }
  0xea   : > { %v814_v60 = vadd.f32 %v810_v50, %v779_v59 }
  0xef   : > { %v777_v63 = vpop.f32.mrf.mxu2 }
  0xf1   : > { %v858_v21 = vpop.f32.mrf.mxu0 }
  0xf2   : > { %v862_v35 = vadd.f32 %v858_v21, %v814_v60 }
  0xf4   : > { %v863_v2 = vpack.c.bf16 %v862_v35, %v862_v35  ;;  %v867_v6 = vsel %vm866_vm4, %v862_v35, 0.0  ;;  %v870_v45 = vmul.f32 %v862_v35, %v862_v35 }
  0xf5   : > { %868 = vadd.xlane.f32.xlu0 %v867_v6 }
  0xf6   : > { %865 = vst.msk [vmem:[%s175_s14] sm:$0xf] %vm864_vm5, %v863_v2  ;;  %v871_v61 = vsel %vm866_vm4, %v870_v45, 0.0 }
  0xf9   : > { %v860_v22 = vpop.f32.mrf.mxu0 }
  0xfd   : > { %872 = vadd.xlane.f32.xlu0 %v871_v61 }
 0x168   : > { %v869_v13 = vpop.xlane.xlu0 %868 }
 0x170   : > { %v873_v0 = vpop.xlane.xlu0 %872 }
 0x171   : > { %v875_v3 = vsel %vm874_vm6, %v869_v13, %v873_v0 }
 0x172   : > { %877 = vst.msk [vmem:[%s179_s18] sm:$0xff] %vm876_vm7, %v875_v3 }
 0x173 PF: > { %s14_s12 = sadd.s32 1, %s1036_s12  }
 0x174   : > { %p11_p4 = scmp.ge.s32.totalorder %s14_s12, 4  }
 0x176   :  { %13 = sbr.rel (!%p11_p4) target bundleno = 1 (0x1), region = 70 }

</bundles_post_ra>
